<compile_context>
chip_gen: v7x
topology: tpu7x:2x2x1
jax: 0.10.0
libtpu: 0.0.40
codegen_flags: <defaults>
</compile_context>

<pallas_src>
import functools
import math

import jax
import jax.numpy as jnp
from jax.experimental import pallas as pl
from jax.experimental.pallas import tpu as pltpu


# --------------------------------------------------------------------------
# Kernels
# --------------------------------------------------------------------------

def _sdpa_kernel(q_ref, k_ref, v_ref, score_ref, out_ref, *, inv_sqrt_dk):
    # Blocks: q (1, th, tq, d_k), k (1, th, S, d_k), v (1, th, S, d_v).
    q = q_ref[0]                      # (th, tq, d_k)  native dtype feeds the MXU
    k = k_ref[0]                      # (th, S,  d_k)
    v = v_ref[0]                      # (th, S,  d_v)

    # QK^T for all heads in the tile: one batched MXU contraction, f32 accumulate.
    # NOTE: if a bundle dump shows a vxpose for the K operand, pre-transpose K
    # to (B, H, d_k, S) in the wrapper and contract 'hqd,hdk->hqk' instead.
    s = jnp.einsum("hqd,hkd->hqk", q, k,
                   preferred_element_type=jnp.float32)          # (th, tq, S) f32
    # Scale the f32 scores (PyTorch scales the scores, not q) — exact for bf16 inputs.
    s = s * inv_sqrt_dk

    # Numerically stable softmax over the key axis: exp on the EUP slot,
    # max/sum reductions on the XLU slot, keeping the VALU free.
    m = jnp.max(s, axis=-1, keepdims=True)
    e = jnp.exp(s - m)
    denom = jnp.sum(e, axis=-1, keepdims=True)
    # Exact reciprocal on the reduced (th, tq, 1) tensor is essentially free;
    # the stored probabilities match an exact softmax (no approx-recip error).
    p = e * (1.0 / denom)

    # Cast the probability block once; reuse it for the lane-dense score store
    # and the PV matmul when the dtypes agree (saves a full convert pass).
    if score_ref.dtype == v_ref.dtype:
        p_lo = p.astype(v_ref.dtype)
        score_ref[0] = p_lo
        p_mm = p_lo
    else:
        score_ref[0] = p.astype(score_ref.dtype)
        p_mm = p.astype(v_ref.dtype)

    # Second batched contraction: (th, tq, S) @ (th, S, d_v) -> (th, tq, d_v).
    o = jnp.einsum("hqk,hkd->hqd", p_mm, v,
                   preferred_element_type=jnp.float32)
    out_ref[0] = o.astype(out_ref.dtype)


def _flash_kernel(q_ref, k_ref, v_ref, o_ref, m_sc, l_sc, acc_sc, *, inv_sqrt_dk):
    # No-score variant: online softmax over the K grid axis (axis 3, "arbitrary").
    kk = pl.program_id(3)

    @pl.when(kk == 0)
    def _init():
        m_sc[...] = jnp.full(m_sc.shape, -jnp.inf, m_sc.dtype)
        l_sc[...] = jnp.zeros(l_sc.shape, l_sc.dtype)
        acc_sc[...] = jnp.zeros(acc_sc.shape, acc_sc.dtype)

    q = q_ref[0]                      # (th, tq, d_k)
    k = k_ref[0]                      # (th, tk, d_k)
    v = v_ref[0]                      # (th, tk, d_v)

    s = jnp.einsum("hqd,hkd->hqk", q, k,
                   preferred_element_type=jnp.float32) * inv_sqrt_dk

    m_prev = m_sc[...]
    m_new = jnp.maximum(m_prev, jnp.max(s, axis=-1, keepdims=True))
    alpha = jnp.exp(m_prev - m_new)
    p = jnp.exp(s - m_new)
    l_sc[...] = alpha * l_sc[...] + jnp.sum(p, axis=-1, keepdims=True)
    acc_sc[...] = alpha * acc_sc[...] + jnp.einsum(
        "hqk,hkd->hqd", p.astype(v.dtype), v, preferred_element_type=jnp.float32)
    m_sc[...] = m_new

    @pl.when(kk == pl.num_programs(3) - 1)
    def _finalize():
        o_ref[0] = (acc_sc[...] * (1.0 / l_sc[...])).astype(o_ref.dtype)


# --------------------------------------------------------------------------
# Tile / VMEM planning
# --------------------------------------------------------------------------

def _q_tile_candidates(S):
    """Tile sizes along a length-S axis, preference-ordered: multiples of 256
    (full MXU M-occupancy on v6e/v7x), then 128 (v5e), then 8 (sublane
    granularity), each largest-first; S itself as a last resort."""
    cands = []
    for align in (256, 128, 8):
        upper = (S // align) * align
        cands.extend(c for c in range(upper, 0, -align) if S % c == 0)
    cands.append(S)
    seen = set()
    return [c for c in cands if not (c in seen or seen.add(c))]


def _head_tile_candidates(H):
    return sorted((h for h in range(1, H + 1) if H % h == 0), reverse=True)


def _score_working_set(th, tq, S, d_k, d_v, qkv_bytes, score_bytes, out_bytes,
                       kv_buffers):
    kv = kv_buffers * th * S * (d_k + d_v) * qkv_bytes     # K + V blocks
    qb = 2 * th * tq * d_k * qkv_bytes                     # q block (double-buffered)
    sc = 2 * th * tq * S * score_bytes                     # score block
    ob = 2 * th * tq * d_v * out_bytes                     # out block
    return kv + qb + sc + ob


def _pick_score_tiles(H, S, d_k, d_v, qkv_bytes, score_bytes, out_bytes,
                      budget_bytes, kv_buffers):
    q_cands = _q_tile_candidates(S)
    h_cands = _head_tile_candidates(H)
    for tq in q_cands:
        for th in h_cands:
            if _score_working_set(th, tq, S, d_k, d_v, qkv_bytes, score_bytes,
                                  out_bytes, kv_buffers) <= budget_bytes:
                return th, tq
    # Nothing fits the budget: fall back to the *smallest* tiles (never the
    # largest — the old fallback returned the tile that had already failed).
    return h_cands[-1], q_cands[-1]


def _pick_flash_tiles(H, S, d_k, d_v, qkv_bytes, budget_bytes):
    t_cands = _q_tile_candidates(S)
    h_cands = _head_tile_candidates(H)

    def ws(th, t):
        kv = 2 * 2 * th * t * (d_k + d_v) * qkv_bytes      # double-buffered K and V
        qb = 2 * th * t * d_k * qkv_bytes
        ob = 2 * th * t * d_v * qkv_bytes
        scratch = th * t * (d_v + 2) * 4                   # acc + m + l (f32)
        inter = 2 * th * t * t * 4                         # s / p intermediates (f32)
        return kv + qb + ob + scratch + inter

    for t in t_cands:
        for th in h_cands:
            if ws(th, t) <= budget_bytes:
                return th, t, t
    return h_cands[-1], t_cands[-1], t_cands[-1]


def _vmem_limit(working_set_bytes):
    # Explicit scoped-VMEM limit: working set + headroom for Pallas-internal
    # scratch, clamped to [32 MiB, 64 MiB] (v7x physical VMEM is 64 MiB).
    return int(min(64 << 20, max(32 << 20, working_set_bytes * 5 // 4 + (2 << 20))))


# --------------------------------------------------------------------------
# Wrappers
# --------------------------------------------------------------------------

def scaled_dot_product_attention(q, k, v, *, score_dtype=jnp.bfloat16,
                                 q_tile=None, head_tile=None, kv_buffers=None,
                                 vmem_budget_bytes=40 << 20,
                                 vmem_limit_bytes=None):
    """Pallas TPU ScaledDotProductAttention (mask=None, dropout=None path).

    q, k: (B, H, S, d_k); v: (B, H, S, d_v).
    Returns (score, output): score (B, H, S, S), output (B, H, S, d_v), matching
    `softmax(q @ k^T / sqrt(d_k)) @ v`.

    score_dtype defaults to bfloat16: the score writeback is the dominant O(S^2)
    HBM stream on every TPU generation, and bf16 halves it.  Pass
    score_dtype=q.dtype (e.g. float32) for exact dtype parity with PyTorch, or
    use `attention_output_only` if the probabilities are not needed at all.

    kv_buffers: optional pipelining depth for the K/V blocks (e.g. 1 halves
    their resident VMEM on v7x; their block index only changes per (b, h) so
    the exposed DMA is amortized over all q tiles).
    """
    B, H, S, d_k = q.shape
    d_v = v.shape[-1]
    score_dtype = jnp.dtype(score_dtype if score_dtype is not None else q.dtype)

    qkv_bytes = jnp.dtype(q.dtype).itemsize
    out_bytes = qkv_bytes
    score_bytes = score_dtype.itemsize
    kv_buf = 2 if kv_buffers is None else int(kv_buffers)

    auto_th, auto_tq = _pick_score_tiles(H, S, d_k, d_v, qkv_bytes, score_bytes,
                                         out_bytes, vmem_budget_bytes, kv_buf)
    th = head_tile or auto_th
    tq = q_tile or auto_tq
    assert H % th == 0, "head_tile must divide H"
    assert S % tq == 0, "q_tile must divide S"

    if vmem_limit_bytes is None:
        ws = _score_working_set(th, tq, S, d_k, d_v, qkv_bytes, score_bytes,
                                out_bytes, kv_buf)
        vmem_limit_bytes = _vmem_limit(ws)

    kernel = functools.partial(_sdpa_kernel, inv_sqrt_dk=1.0 / math.sqrt(d_k))
    kv_kwargs = {} if kv_buffers is None else dict(pipeline_mode=pl.Buffered(kv_buf))

    score, out = pl.pallas_call(
        kernel,
        out_shape=(
            jax.ShapeDtypeStruct((B, H, S, S), score_dtype),
            jax.ShapeDtypeStruct((B, H, S, d_v), q.dtype),
        ),
        grid_spec=pltpu.PrefetchScalarGridSpec(
            num_scalar_prefetch=0,
            # Batch / head-tile axes first so a v7x megacore split lands there
            # (never duplicating the full K/V DMA across the two TensorCores);
            # the q axis is innermost so K/V blocks are re-fetched only per (b, h).
            grid=(B, H // th, S // tq),
            in_specs=[
                pl.BlockSpec((1, th, tq, d_k), lambda b, h, i: (b, h, i, 0)),
                pl.BlockSpec((1, th, S, d_k), lambda b, h, i: (b, h, 0, 0), **kv_kwargs),
                pl.BlockSpec((1, th, S, d_v), lambda b, h, i: (b, h, 0, 0), **kv_kwargs),
            ],
            out_specs=[
                pl.BlockSpec((1, th, tq, S), lambda b, h, i: (b, h, i, 0)),
                pl.BlockSpec((1, th, tq, d_v), lambda b, h, i: (b, h, i, 0)),
            ],
        ),
        compiler_params=pltpu.CompilerParams(
            dimension_semantics=("parallel", "parallel", "arbitrary"),
            vmem_limit_bytes=vmem_limit_bytes,
        ),
    )(q, k, v)
    return score, out


def attention_output_only(q, k, v, *, q_tile=None, k_tile=None, head_tile=None,
                          vmem_budget_bytes=40 << 20, vmem_limit_bytes=None):
    """Flash-style variant: returns only `output`, never writing the (B,H,S,S)
    score to HBM (online softmax over a K grid axis marked "arbitrary")."""
    B, H, S, d_k = q.shape
    d_v = v.shape[-1]
    qkv_bytes = jnp.dtype(q.dtype).itemsize

    auto_th, auto_tq, auto_tk = _pick_flash_tiles(H, S, d_k, d_v, qkv_bytes,
                                                  vmem_budget_bytes)
    th = head_tile or auto_th
    tq = q_tile or auto_tq
    tk = k_tile or auto_tk
    assert H % th == 0 and S % tq == 0 and S % tk == 0

    if vmem_limit_bytes is None:
        ws = (2 * 2 * th * tk * (d_k + d_v) * qkv_bytes
              + 2 * th * tq * (d_k + d_v) * qkv_bytes
              + th * tq * (d_v + 2) * 4 + 2 * th * tq * tk * 4)
        vmem_limit_bytes = _vmem_limit(ws)

    kernel = functools.partial(_flash_kernel, inv_sqrt_dk=1.0 / math.sqrt(d_k))

    out = pl.pallas_call(
        kernel,
        out_shape=jax.ShapeDtypeStruct((B, H, S, d_v), q.dtype),
        grid_spec=pltpu.PrefetchScalarGridSpec(
            num_scalar_prefetch=0,
            grid=(B, H // th, S // tq, S // tk),
            in_specs=[
                pl.BlockSpec((1, th, tq, d_k), lambda b, h, i, j: (b, h, i, 0)),
                pl.BlockSpec((1, th, tk, d_k), lambda b, h, i, j: (b, h, j, 0)),
                pl.BlockSpec((1, th, tk, d_v), lambda b, h, i, j: (b, h, j, 0)),
            ],
            out_specs=pl.BlockSpec((1, th, tq, d_v), lambda b, h, i, j: (b, h, i, 0)),
            scratch_shapes=[
                pltpu.VMEM((th, tq, 1), jnp.float32),    # running max
                pltpu.VMEM((th, tq, 1), jnp.float32),    # running denom
                pltpu.VMEM((th, tq, d_v), jnp.float32),  # accumulator
            ],
        ),
        compiler_params=pltpu.CompilerParams(
            dimension_semantics=("parallel", "parallel", "parallel", "arbitrary"),
            vmem_limit_bytes=vmem_limit_bytes,
        ),
    )(q, k, v)
    return out


# --------------------------------------------------------------------------
# Reference + test
# --------------------------------------------------------------------------

def reference(q, k, v, d_k):
    """Pure-JAX mirror of the PyTorch forward (mask=None, dropout=None)."""
    s = jnp.einsum("bhqd,bhkd->bhqk", q, k) / math.sqrt(d_k)
    p = jax.nn.softmax(s, axis=-1)
    o = jnp.einsum("bhqk,bhkd->bhqd", p, v)
    return p, o


if __name__ == "__main__":
    # Small shapes consistent with the module.
    B, H, S, d_k, d_v = 2, 4, 8, 8, 8

    key = jax.random.PRNGKey(0)
    kq, kk, kv = jax.random.split(key, 3)
    q = jax.random.normal(kq, (B, H, S, d_k), jnp.float32)
    k = jax.random.normal(kk, (B, H, S, d_k), jnp.float32)
    v = jax.random.normal(kv, (B, H, S, d_v), jnp.float32)

    score_ref, out_ref = reference(q, k, v, d_k)

    # 1) Exact-dtype path (score_dtype = float32), matches PyTorch semantics.
    score32, out32 = scaled_dot_product_attention(q, k, v, score_dtype=jnp.float32)
    score32, out32 = jax.block_until_ready((score32, out32))
    assert score32.shape == (B, H, S, S) and out32.shape == (B, H, S, d_v)
    assert jnp.allclose(score32, score_ref, atol=2e-3, rtol=2e-3)
    assert jnp.allclose(out32, out_ref, atol=2e-3, rtol=2e-3)

    # 2) Default path: bf16 score output (halves the dominant HBM write stream).
    score_bf16, out_def = jax.block_until_ready(scaled_dot_product_attention(q, k, v))
    assert score_bf16.dtype == jnp.bfloat16
    assert jnp.allclose(score_bf16.astype(jnp.float32), score_ref, atol=1e-2, rtol=1e-2)
    assert jnp.allclose(out_def, out_ref, atol=2e-3, rtol=2e-3)

    # 3) Flash-style no-score variant.
    out_flash = jax.block_until_ready(attention_output_only(q, k, v))
    assert jnp.allclose(out_flash, out_ref, atol=2e-3, rtol=2e-3)

    print("KERNEL_OK")
</pallas_src>

<mosaic_0001>
module attributes {stable_mosaic.version = 11 : i64} {
  func.func @_sdpa_kernel(%arg0: i32, %arg1: i32, %arg2: i32, %arg3: memref<1x4x8x8xf32, #tpu.memory_space<vmem>>, %arg4: memref<1x4x8x8xf32, #tpu.memory_space<vmem>>, %arg5: memref<1x4x8x8xf32, #tpu.memory_space<vmem>>, %arg6: memref<1x4x8x8xf32, #tpu.memory_space<vmem>>, %arg7: memref<1x4x8x8xf32, #tpu.memory_space<vmem>>) attributes {dimension_semantics = [#tpu.dimension_semantics<parallel>, #tpu.dimension_semantics<parallel>, #tpu.dimension_semantics<arbitrary>], iteration_bounds = array<i64: 2, 1, 1>, scalar_prefetch = 0 : i64, scratch_operands = 0 : i64, tpu.core_type = #tpu.core_type<tc>, window_params = [{transform_indices = @transform_0, window_bounds = array<i64: 1, 4, 8, 8>}, {transform_indices = @transform_1, window_bounds = array<i64: 1, 4, 8, 8>}, {transform_indices = @transform_2, window_bounds = array<i64: 1, 4, 8, 8>}, {transform_indices = @transform_3, window_bounds = array<i64: 1, 4, 8, 8>}, {transform_indices = @transform_4, window_bounds = array<i64: 1, 4, 8, 8>}]} {
    %c0 = arith.constant 0 : index
    %c0_0 = arith.constant 0 : index
    %c0_1 = arith.constant 0 : index
    %c0_2 = arith.constant 0 : index
    %0 = vector.load %arg3[%c0, %c0_0, %c0_1, %c0_2] : memref<1x4x8x8xf32, #tpu.memory_space<vmem>>, vector<1x4x8x8xf32>
    %1 = vector.shape_cast %0 : vector<1x4x8x8xf32> to vector<4x8x8xf32>
    %c0_3 = arith.constant 0 : index
    %c0_4 = arith.constant 0 : index
    %c0_5 = arith.constant 0 : index
    %c0_6 = arith.constant 0 : index
    %2 = vector.load %arg4[%c0_3, %c0_4, %c0_5, %c0_6] : memref<1x4x8x8xf32, #tpu.memory_space<vmem>>, vector<1x4x8x8xf32>
    %3 = vector.shape_cast %2 : vector<1x4x8x8xf32> to vector<4x8x8xf32>
    %c0_7 = arith.constant 0 : index
    %c0_8 = arith.constant 0 : index
    %c0_9 = arith.constant 0 : index
    %c0_10 = arith.constant 0 : index
    %4 = vector.load %arg5[%c0_7, %c0_8, %c0_9, %c0_10] : memref<1x4x8x8xf32, #tpu.memory_space<vmem>>, vector<1x4x8x8xf32>
    %5 = vector.shape_cast %4 : vector<1x4x8x8xf32> to vector<4x8x8xf32>
    "tpu.trace_start"() <{level = 10 : i32, message = "hqd,hkd->hqk"}> : () -> ()
    %cst = arith.constant dense<0.000000e+00> : vector<4x8x8xf32>
    %6 = tpu.matmul %1, %3, %cst {dimension_numbers = #tpu.dot_dimension_numbers<[2], [2], [1], [1], [0, 0, 0, 1, 1, 1], [0], [0]>} : vector<4x8x8xf32>, vector<4x8x8xf32>, vector<4x8x8xf32> -> vector<4x8x8xf32>
    "tpu.trace_stop"() : () -> ()
    %cst_11 = arith.constant 0.353553385 : f32
    %7 = vector.broadcast %cst_11 : f32 to vector<4x8x8xf32>
    %8 = arith.mulf %6, %7 : vector<4x8x8xf32>
    %cst_12 = arith.constant dense<0xFF800000> : vector<4x8xf32>
    %9 = vector.multi_reduction <maximumf>, %8, %cst_12 [2] : vector<4x8x8xf32> to vector<4x8xf32>
    %10 = vector.shape_cast %9 : vector<4x8xf32> to vector<4x8x1xf32>
    %11 = vector.broadcast %10 : vector<4x8x1xf32> to vector<4x8x8xf32>
    %12 = arith.subf %8, %11 : vector<4x8x8xf32>
    %13 = math.exp %12 : vector<4x8x8xf32>
    %cst_13 = arith.constant dense<0.000000e+00> : vector<4x8xf32>
    %14 = vector.multi_reduction <add>, %13, %cst_13 [2] : vector<4x8x8xf32> to vector<4x8xf32>
    %15 = vector.shape_cast %14 : vector<4x8xf32> to vector<4x8x1xf32>
    %cst_14 = arith.constant 1.000000e+00 : f32
    %16 = vector.broadcast %cst_14 : f32 to vector<4x8x1xf32>
    %17 = arith.divf %16, %15 : vector<4x8x1xf32>
    %18 = vector.broadcast %17 : vector<4x8x1xf32> to vector<4x8x8xf32>
    %19 = arith.mulf %13, %18 : vector<4x8x8xf32>
    %c0_15 = arith.constant 0 : index
    %c0_16 = arith.constant 0 : index
    %c0_17 = arith.constant 0 : index
    %c0_18 = arith.constant 0 : index
    %20 = vector.load %arg6[%c0_15, %c0_16, %c0_17, %c0_18] : memref<1x4x8x8xf32, #tpu.memory_space<vmem>>, vector<1x4x8x8xf32>
    %21 = vector.shape_cast %20 : vector<1x4x8x8xf32> to vector<4x8x8xf32>
    %22 = vector.shape_cast %19 : vector<4x8x8xf32> to vector<1x4x8x8xf32>
    tpu.vector_store %arg6[%c0_15, %c0_16, %c0_17, %c0_18], %22 {strides = array<i32>} : memref<1x4x8x8xf32, #tpu.memory_space<vmem>>, vector<1x4x8x8xf32>,
    "tpu.trace_start"() <{level = 10 : i32, message = "hqk,hkd->hqd"}> : () -> ()
    %cst_19 = arith.constant dense<0.000000e+00> : vector<4x8x8xf32>
    %23 = tpu.matmul %19, %5, %cst_19 {dimension_numbers = #tpu.dot_dimension_numbers<[2], [1], [1], [2], [0, 0, 0, 1, 1, 2], [0], [0]>} : vector<4x8x8xf32>, vector<4x8x8xf32>, vector<4x8x8xf32> -> vector<4x8x8xf32>
    "tpu.trace_stop"() : () -> ()
    %c0_20 = arith.constant 0 : index
    %c0_21 = arith.constant 0 : index
    %c0_22 = arith.constant 0 : index
    %c0_23 = arith.constant 0 : index
    %24 = vector.load %arg7[%c0_20, %c0_21, %c0_22, %c0_23] : memref<1x4x8x8xf32, #tpu.memory_space<vmem>>, vector<1x4x8x8xf32>
    %25 = vector.shape_cast %24 : vector<1x4x8x8xf32> to vector<4x8x8xf32>
    %26 = vector.shape_cast %23 : vector<4x8x8xf32> to vector<1x4x8x8xf32>
    tpu.vector_store %arg7[%c0_20, %c0_21, %c0_22, %c0_23], %26 {strides = array<i32>} : memref<1x4x8x8xf32, #tpu.memory_space<vmem>>, vector<1x4x8x8xf32>,
    return
  }
  func.func @transform_0(%arg0: i32, %arg1: i32, %arg2: i32) -> (i32, i32, i32, i32) {
    %c0_i32 = arith.constant 0 : i32
    %c0_i32_0 = arith.constant 0 : i32
    return %arg0, %arg1, %arg2, %c0_i32 : i32, i32, i32, i32
  }
  func.func @transform_1(%arg0: i32, %arg1: i32, %arg2: i32) -> (i32, i32, i32, i32) {
    %c0_i32 = arith.constant 0 : i32
    %c0_i32_0 = arith.constant 0 : i32
    %c0_i32_1 = arith.constant 0 : i32
    return %arg0, %arg1, %c0_i32, %c0_i32_0 : i32, i32, i32, i32
  }
  func.func @transform_2(%arg0: i32, %arg1: i32, %arg2: i32) -> (i32, i32, i32, i32) {
    %c0_i32 = arith.constant 0 : i32
    %c0_i32_0 = arith.constant 0 : i32
    %c0_i32_1 = arith.constant 0 : i32
    return %arg0, %arg1, %c0_i32, %c0_i32_0 : i32, i32, i32, i32
  }
  func.func @transform_3(%arg0: i32, %arg1: i32, %arg2: i32) -> (i32, i32, i32, i32) {
    %c0_i32 = arith.constant 0 : i32
    %c0_i32_0 = arith.constant 0 : i32
    return %arg0, %arg1, %arg2, %c0_i32 : i32, i32, i32, i32
  }
  func.func @transform_4(%arg0: i32, %arg1: i32, %arg2: i32) -> (i32, i32, i32, i32) {
    %c0_i32 = arith.constant 0 : i32
    %c0_i32_0 = arith.constant 0 : i32
    return %arg0, %arg1, %arg2, %c0_i32 : i32, i32, i32, i32
  }
}

</mosaic_0001>

<bundles_post_ra>
// kernel: tpu_custom_call.1
= control target key start
LH: loop header
LB: loop body
LE: loop exit
PB: predicated region body
PF: predicated region fallthrough
CT: control target
= control target key end

     0   :  { %s2067_s0 = inlined_call_operand.hbm [shape: f32[2,4,8,8], index: 0, kind: input, shape index: {}]   ;;  %s2068_s1 = inlined_call_operand.hbm [shape: f32[2,4,8,8], index: 1, kind: input, shape index: {}]   ;;  %s2069_s2 = inlined_call_operand.hbm [shape: f32[2,4,8,8], index: 2, kind: input, shape index: {}]   ;;  %s2070_s3 = inlined_call_operand.hbm [shape: f32[2,4,8,8], index: 3, kind: output, shape index: {0}]   ;;  %s2071_s4 = inlined_call_operand.hbm [shape: f32[2,4,8,8], index: 4, kind: output, shape index: {1}]  }
   0x1   :  { %2083 = sst [smem:[#allocation19_spill]] %s2068_s1 }
   0x2   :  { %10 = vsyncpa [#allocation3], 0 }
   0x3   :  { %12 = vsyncpa [#allocation3 + $0x1], 0 }
   0x4   :  { %13 = vsyncpa [#allocation6], 0 }
   0x5   :  { %15 = vsyncpa [#allocation6 + $0x1], 0 }
   0x6   :  { %16 = vsyncpa [#allocation4], 0 }
   0x7   :  { %18 = vsyncpa [#allocation4 + $0x1], 0 }
   0x8   :  { %19 = vsyncpa [#allocation10], 0 }
   0x9   :  { %21 = vsyncpa [#allocation10 + $0x1], 0  ;;  %s1683_s15 = smov 0   ;;  %s1685_s16 = smov 0  }
   0xa   :  { %s1687_s17 = smov 0   ;;  %s1689_s18 = smov 0  }
   0xb   :  { %s1691_s19 = smov 0   ;;  %s1693_s20 = smov 0  }
   0xc LB: > { %2084 = sst [smem:[#allocation15_spill]] %s1641_s19  ;;  %s1714_s21 = sadd.s32 4294967295, %s1645_s20   ;;  %s1645_s20 = sphi %s1693_s20, %s27_s20   ;;  %s1641_s19 = sphi %s1691_s19, %s2109_s19   ;;  %s1637_s18 = sphi %s1689_s18, %s2108_s18   ;;  %s1633_s17 = sphi %s1687_s17, %s2112_s17   ;;  %s1629_s16 = sphi %s1685_s16, %s2111_s16   ;;  %s1625_s15 = sphi %s1683_s15, %s2110_s15  }
   0xd   : > { %2085 = sst [smem:[#allocation16_spill]] %s1645_s20  ;;  %s1239_s22 = sadd.s32 4294967294, %s1645_s20  }
   0xe   : > { %s46_s23 = sadd.s32 1, %s1641_s19  ;;  %s57_s24 = sadd.s32 1, %s1633_s17 }
   0xf   : > { %p48_p0 = scmp.ge.s32.totalorder %s46_s23, 2  ;;  %p64_p1 = scmp.ne.s32.totalorder %s1633_s17, %s1629_s16 }
  0x10   : > { %p65_p2 = scmp.eq.s32.totalorder %s1645_s20, 0  ;;  %p70_p3 = scmp.ne.s32.totalorder %s1629_s16, %s1625_s15 }
  0x11   : > { %s2114_s23 = smov (%p48_p0, %s46_s23), 0  ;;  %p71_p5 = scmp.eq.s32.totalorder %s1714_s21, 0 }
  0x12   : > { %2086 = sst [smem:[#allocation17_spill]] %s2114_s23  ;;  %p1726_p4 = por %p65_p2, %p64_p1 }
  0x13   : > { %s50_s26 = ssub.s32 %s1641_s19, %s2114_s23  ;;  %p154_p6 = scmp.eq.s32.totalorder %s1714_s21, 1 }
  0x14   : > { %p55_p7 = scmp.eq.s32.totalorder %s50_s26, 0  ;;  %p1734_p8 = por %p71_p5, %p70_p3 }
  0x15   : > { %p1738_p9 = por %p154_p6, %p64_p1  ;;  %p160_p10 = scmp.eq.s32.totalorder %s1239_s22, 1 }
  0x16   : > { %s2088_s27 = scalar_select %p1734_p8, 1, 0 }
  0x17   : > { %s2089_s28 = scalar_select %p1738_p9, 1, 0 }
  0x18   : > { %s1743_s29 = scalar_select %p55_p7, %s1633_s17, %s57_s24  }
  0x19   : > { %p1745_p11 = por %p160_p10, %p70_p3  ;;  %p1365_p13 = scmp.lt.s32.totalorder %s1645_s20, 2 }
  0x1a   : > { %2090 = sst [smem:[#allocation18_spill]] %s1743_s29  ;;  %s2072_s5 = sand.u32 1, %s1633_s17  }
  0x1b   : > { %s2091_s30 = scalar_select %p1745_p11, 1, 0 }
  0x1c   : > { %s1754_s6 = sshll.u32 %s2072_s5, 5  ;;  %s1757_s7 = sshll.u32 %s1641_s19, 9 }
  0x1d   : > { %p1761_p0 = pnand %p1365_p13, %p1726_p4  ;;  %s234_s9 = sand.u32 1, %s1645_s20  }
  0x1e   : > { %s2093_s1 = sld [smem:[#allocation19_spill]]  ;;  %s238_s13 = scalar_lea.vmem [#allocation5], %s1754_s6 }
  0x1f   : > { %s247_s14 = sshll.u32 %s238_s13, 4  ;;  %s1777_s22 = scalar_lea.sflag [#allocation6], %s234_s9  ;;  %s1774_s14 = int_to_ptr.vmem [resolvable:$true] %s247_s14 }
  0x20   : > { %p1783_p4 = pneg %p1761_p0 }
  0x24   : > { %s1770_s12 = scalar_lea.hbm %s2093_s1, %s1757_s7  ;;  %s1442_s11 = scalar_lea.hbm %s2093_s1, 1024 }
  0x25   : > { %s1437_s24 = scalar_lea.hbm %s1770_s12, 512  ;;  %p1443_p7 = scmp.lt.u32.totalorder %s1770_s12, %s2093_s1 }
  0x26   : > { %p1438_p3 = scmp.ne.s32.totalorder %s1770_s12, %s1437_s24  ;;  %p1444_p10 = scmp.lt.u32.totalorder %s1442_s11, %s1437_s24 }
  0x27   : > { %p1446_p12 = scmp.lt.u32.totalorder %s1437_s24, %s1770_s12 }
  0x28   : > { %p1440_p5 = pnand %p1783_p4, %p1438_p3  ;;  %p1445_p13 = por %p1444_p10, %p1443_p7 }
  0x2a   : > { %p1441_p6 = pneg %p1440_p5  ;;  %p1447_p1 = por %p1446_p12, %p1445_p13 }
  0x2c   : > { %p1448_p2 = pnand %p1447_p1, %p1441_p6 }
  0x2e   : > { %1451 = shalt.err (!%p1448_p2)
}
  0x2f   : > { %s1452_s9 = scalar_lea.vmem %s1774_s14, 512  ;;  %s1647_s26 = smov [#allocation5]  }
  0x30   : > { %p1453_p3 = scmp.ne.s32.totalorder %s1774_s14, %s1452_s9  ;;  %s1457_s10 = sshll.u32 %s1647_s26, 4  ;;  %s1458_s10 = int_to_ptr.vmem [resolvable:$false] %s1457_s10 }
  0x31   : > { %s1459_s5 = scalar_lea.vmem %s1458_s10, 1024  ;;  %p1460_p9 = scmp.lt.s32.totalorder %s1774_s14, %s1458_s10 }
  0x32   : > { %p1455_p5 = pnand %p1453_p3, %p1783_p4  ;;  %p1461_p8 = scmp.lt.s32.totalorder %s1459_s5, %s1452_s9 }
  0x34   : > { %p1456_p11 = pneg %p1455_p5  ;;  %p1462_p7 = por %p1461_p8, %p1460_p9 }
  0x36   : > { %p1463_p10 = pnand %p1462_p7, %p1456_p11 }
  0x38   : > { %1466 = shalt.err (!%p1463_p10)
}
  0x39   : > { %s2075_s24 = smov 128   ;;  %s2077_s11 = smov 8  }
  0x3a   : > { %1354 = dma.hbm_to_vmem [thread:$0]  (!%p1761_p0), %s1770_s12, 512, %s1774_s14, %s1777_s22, %s2075_s24, %s2075_s24, %s2077_s11  }
  0x3b   : > { %p2095_p8 = scmp.lt.s32.totalorder %s1645_s20, 3  ;;  %p2096_p9 = scmp.ge.s32.totalorder %s1645_s20, 1 }
  0x3c   : > { %s1822_s10 = scalar_lea.hbm %s2067_s0, %s1757_s7  ;;  %s214_s5 = scalar_lea.vmem [#allocation2], %s1754_s6 }
  0x3d   : > { %p1814_p11 = pnand %p2096_p9, %p2095_p8  ;;  %s224_s1 = sshll.u32 %s214_s5, 4  ;;  %s1825_s1 = int_to_ptr.vmem [resolvable:$true] %s224_s1 }
  0x3e   : > { %s1831_s24 = scalar_lea.hbm %s2069_s2, %s1757_s7  ;;  %s2098_s11 = sand.u32 1, %s1633_s17  }
  0x3f   : > { %s2097_s13 = scalar_select %p1814_p11, 1, 0 }
  0x40   : > { %s1835_s23 = scalar_lea.sflag [#allocation3], %s2098_s11  ;;  %s1467_s19 = scalar_lea.hbm %s1822_s10, 512 }
  0x41   : > { %p1468_p12 = scmp.ne.s32.totalorder %s1822_s10, %s1467_s19  ;;  %s1472_s29 = scalar_lea.hbm %s2067_s0, 1024 }
  0x42   : > { %p1473_p6 = scmp.lt.u32.totalorder %s1822_s10, %s2067_s0  ;;  %p1474_p13 = scmp.lt.u32.totalorder %s1472_s29, %s1467_s19 }
  0x43   : > { %p1470_p1 = pnand %p1468_p12, %p1783_p4  ;;  %p1476_p5 = scmp.lt.u32.totalorder %s1467_s19, %s1822_s10 }
  0x44   : > { %p1475_p3 = por %p1474_p13, %p1473_p6 }
  0x45   : > { %p1471_p2 = pneg %p1470_p1 }
  0x46   : > { %p1477_p7 = por %p1476_p5, %p1475_p3 }
  0x48   : > { %p1478_p10 = pnand %p1477_p7, %p1471_p2 }
  0x4a   : > { %1481 = shalt.err (!%p1478_p10)
}
  0x4b   : > { %s1482_s7 = scalar_lea.vmem %s1825_s1, 512  ;;  %s1650_s11 = smov [#allocation2]  }
  0x4c   : > { %p1483_p8 = scmp.ne.s32.totalorder %s1825_s1, %s1482_s7  ;;  %s1487_s12 = sshll.u32 %s1650_s11, 4  ;;  %s1488_s12 = int_to_ptr.vmem [resolvable:$false] %s1487_s12 }
  0x4d   : > { %s1489_s20 = scalar_lea.vmem %s1488_s12, 1024  ;;  %p1490_p1 = scmp.lt.s32.totalorder %s1825_s1, %s1488_s12 }
  0x4e   : > { %p1485_p9 = pnand %p1483_p8, %p1783_p4  ;;  %p1491_p11 = scmp.lt.s32.totalorder %s1489_s20, %s1482_s7 }
  0x50   : > { %p1486_p12 = pneg %p1485_p9  ;;  %p1492_p6 = por %p1491_p11, %p1490_p1 }
  0x52   : > { %p1493_p13 = pnand %p1492_p6, %p1486_p12 }
  0x54   : > { %1496 = shalt.err (!%p1493_p13)
}
  0x55   : > { %s2099_s19 = smov 8   ;;  %s2100_s29 = smov 128  }
  0x56   : > { %1351 = dma.hbm_to_vmem [thread:$0]  (!%p1761_p0), %s1822_s10, 512, %s1825_s1, %s1835_s23, %s2100_s29, %s2100_s29, %s2099_s19  }
  0x57   : > { %s261_s14 = scalar_lea.vmem [#allocation7], %s1754_s6  ;;  %s1497_s26 = scalar_lea.hbm %s1831_s24, 512 }
  0x58   : > { %s270_s9 = sshll.u32 %s261_s14, 4  ;;  %p1498_p11 = scmp.ne.s32.totalorder %s1831_s24, %s1497_s26  ;;  %s1863_s9 = int_to_ptr.vmem [resolvable:$true] %s270_s9 }
  0x59   : > { %s1502_s11 = scalar_lea.hbm %s2069_s2, 1024  ;;  %p1503_p5 = scmp.lt.u32.totalorder %s1831_s24, %s2069_s2 }
  0x5a   : > { %p1500_p2 = pnand %p1498_p11, %p1783_p4  ;;  %p1504_p7 = scmp.lt.u32.totalorder %s1502_s11, %s1497_s26 }
  0x5b   : > { %p1506_p8 = scmp.lt.u32.totalorder %s1497_s26, %s1831_s24 }
  0x5c   : > { %p1501_p3 = pneg %p1500_p2  ;;  %p1505_p10 = por %p1504_p7, %p1503_p5 }
  0x5e   : > { %p1507_p9 = por %p1506_p8, %p1505_p10 }
  0x60   : > { %p1508_p12 = pnand %p1507_p9, %p1501_p3 }
  0x62   : > { %1511 = shalt.err (!%p1508_p12)
}
  0x63   : > { %s1512_s1 = scalar_lea.vmem %s1863_s9, 512  ;;  %s1651_s23 = smov [#allocation7]  }
  0x64   : > { %p1513_p1 = scmp.ne.s32.totalorder %s1863_s9, %s1512_s1  ;;  %s1517_s6 = sshll.u32 %s1651_s23, 4  ;;  %s1518_s6 = int_to_ptr.vmem [resolvable:$false] %s1517_s6 }
  0x65   : > { %s1519_s10 = scalar_lea.vmem %s1518_s6, 1024  ;;  %p1520_p11 = scmp.lt.s32.totalorder %s1863_s9, %s1518_s6 }
  0x66   : > { %p1515_p6 = pnand %p1513_p1, %p1783_p4  ;;  %p1521_p2 = scmp.lt.s32.totalorder %s1519_s10, %s1512_s1 }
  0x68   : > { %p1516_p13 = pneg %p1515_p6  ;;  %p1522_p5 = por %p1521_p2, %p1520_p11 }
  0x6a   : > { %p1523_p7 = pnand %p1522_p5, %p1516_p13 }
  0x6c   : > { %1526 = shalt.err (!%p1523_p7)
}
  0x6d   : > { %1357 = dma.hbm_to_vmem [thread:$0]  (!%p1761_p0), %s1831_s24, 512, %s1863_s9, %s1777_s22, %s2100_s29, %s2100_s29, %s2099_s19  }
  0x6e   : > { %p2101_p4 = scmp.ne.s32.totalorder %s2097_s13, 0 }
  0x6f   : > { %s1893_s25 = sand.u32 (!%p2101_p4), 1, %s1629_s16   ;;  %p2102_p3 = scmp.ne.s32.totalorder (!%p2101_p4), %s2088_s27, 0 }
  0x70   : > { %282 = sbr.rel (%p2101_p4) target bundleno = 891 (0x37b), region = 32  ;;  %s1896_s14 = sshll.u32 (!%p2101_p4), %s1893_s25, 5 }
  0x71   : > { %s285_s8 = scalar_lea.sflag (!%p2101_p4), [#allocation3], %s1893_s25  ;;  %s1900_s26 = scalar_lea.vmem (!%p2101_p4), [#allocation2], %s1896_s14 }
  0x77   : > { %1608 = dma.done.wait (%p2102_p3), %s285_s8, 512  }
  0x78   : > { %1610 = vsyncadd (%p2102_p3), %s285_s8, 4294966784  ;;  %s293_s22 = sand.u32 1, %s1714_s21   ;;  %s297_s13 = scalar_lea.vmem [#allocation5], %s1896_s14 }
  0x79   : > { %s294_s24 = scalar_lea.sflag [#allocation6], %s293_s22 }
  0x7a   : > { %1612 = dma.done.wait (%p2102_p3), %s294_s24, 1024  }
  0x7b   : > { %1614 = vsyncadd (%p2102_p3), %s294_s24, 4294966272  ;;  %v1652_v0 = vmov 0.0   ;;  %vm1653_vm0 = vmmov 0   ;;  %vm363_vm1 = vcmask 64512   ;;  %v355_v1 = vld [vmem:[%s297_s13] sm:$0xff]  ;;  %v356_v2 = vld [vmem:[%s297_s13 + $0x8] sm:$0xff] }
  0x7c   : > { %1298 = vmatprep.subr.mxu0 %v1652_v0  ;;  %1300 = vmatprep.mubr.msk.f32.mxu0 %vm1653_vm0, %v1652_v0  ;;  %v351_v3 = vld [vmem:[%s1900_s26] sm:$0xff]  ;;  %v352_v4 = vld [vmem:[%s1900_s26 + $0x8] sm:$0xff]  ;;  %v357_v5 = vld [vmem:[%s297_s13 + $0x10] sm:$0xff]  ;;  %s306_s21 = scalar_lea.vmem [#allocation7], %s1896_s14  ;;  %s338_s27 = scalar_lea.vmem [#allocation8], %s1896_s14 }
  0x7d   : > { %1303 = vmatprep.subr.mxu1 %v1652_v0  ;;  %1305 = vmatprep.mubr.msk.f32.mxu1 %vm1653_vm0, %v1652_v0  ;;  %v358_v6 = vld [vmem:[%s297_s13 + $0x18] sm:$0xff]  ;;  %v353_v7 = vld [vmem:[%s1900_s26 + $0x10] sm:$0xff]  ;;  %v359_v45 = vld [vmem:[%s306_s21] sm:$0xff]  ;;  %s1280_s19 = sshll.u32 %s1637_s18, 9  ;;  %s1042_s7 = sshll.u32 %s338_s27, 4  ;;  %s1974_s7 = int_to_ptr.vmem [resolvable:$true] %s1042_s7 }
  0x7e   : > { %1299 = vmatpush3.xpose.msk.msra.mxu0 %vm363_vm1, %v355_v1  ;;  %1304 = vmatpush3.xpose.msk.msra.mxu1 %vm363_vm1, %v356_v2  ;;  %v354_v8 = vld [vmem:[%s1900_s26 + $0x18] sm:$0xff]  ;;  %v360_v46 = vld [vmem:[%s306_s21 + $0x8] sm:$0xff]  ;;  %v361_v53 = vld [vmem:[%s306_s21 + $0x10] sm:$0xff]  ;;  %s1972_s5 = scalar_lea.hbm %s2070_s3, %s1280_s19  ;;  %s1021_s11 = scalar_lea.sflag [#allocation4], %s1893_s25 }
  0x7f   : > { %1308 = vmatprep.subr.mxu0 %v1652_v0  ;;  %1313 = vmatprep.subr.mxu1 %v1652_v0  ;;  %v362_v57 = vld [vmem:[%s306_s21 + $0x18] sm:$0xff]  ;;  %s1527_s12 = scalar_lea.vmem %s1974_s7, 512  ;;  %p2103_p10 = scmp.ne.s32.totalorder %s2089_s28, 0 }
  0x80   : > { %p1528_p0 = scmp.ne.s32.totalorder %s1974_s7, %s1527_s12  ;;  %s1654_s20 = smov [#allocation8]  }
  0x81   : > { %1301 = vmatmul.mubr.msk.f32.vlgmr.msra.gmra.mrb[0].mxu0 %vm363_vm1, %v351_v3  ;;  %1306 = vmatmul.mubr.msk.f32.vlgmr.msra.gmra.mrb[0].mxu1 %vm363_vm1, %v352_v4  ;;  %s1531_s1 = sshll.u32 %s1654_s20, 4  ;;  %s1532_s1 = int_to_ptr.vmem [resolvable:$false] %s1531_s1 }
  0x82   : > { %1309 = vmatpush3.xpose.msk.msra.mxu0 %vm363_vm1, %v357_v5  ;;  %1310 = vmatprep.mubr.msk.f32.mxu0 %vm1653_vm0, %v1652_v0  ;;  %p1529_p8 = pnand %p1528_p0, %p2103_p10  ;;  %s1533_s23 = scalar_lea.vmem %s1532_s1, 1024 }
  0x83   : > { %1314 = vmatpush3.xpose.msk.msra.mxu1 %vm363_vm1, %v358_v6  ;;  %1315 = vmatprep.mubr.msk.f32.mxu1 %vm1653_vm0, %v1652_v0  ;;  %p1534_p12 = scmp.lt.s32.totalorder %s1974_s7, %s1532_s1  ;;  %p1535_p1 = scmp.lt.s32.totalorder %s1533_s23, %s1527_s12 }
  0x84   : > { %1318 = vmatprep.subr.mxu0 %v1652_v0  ;;  %1323 = vmatprep.subr.mxu1 %v1652_v0  ;;  %p1530_p9 = pneg %p1529_p8 }
  0x85   : > { %1311 = vmatmul.mubr.msk.f32.vlgmr.msra.gmra.mrb[2].mxu0 %vm363_vm1, %v353_v7  ;;  %p1536_p6 = por %p1535_p1, %p1534_p12 }
  0x86   : > { %1316 = vmatmul.mubr.msk.f32.vlgmr.msra.gmra.mrb[2].mxu1 %vm363_vm1, %v354_v8  ;;  %1320 = vmatprep.mubr.msk.f32.mxu0 %vm1653_vm0, %v1652_v0 }
  0x87   : > { %1325 = vmatprep.mubr.msk.f32.mxu1 %vm1653_vm0, %v1652_v0  ;;  %1319 = vmatpush3.msra.mxu0 %v359_v45  ;;  %p1537_p13 = pnand %p1536_p6, %p1530_p9 }
  0x88   : > { %1328 = vmatprep.subr.mxu0 %v1652_v0  ;;  %1324 = vmatpush3.msra.mxu1 %v360_v46 }
  0x89   : > { %1333 = vmatprep.subr.mxu1 %v1652_v0 }
 0x154   : > { %v436_v9 = vpop.f32.mrb[0].mxu0  ;;  %v512_v10 = vpop.f32.mrb[0].mxu1 }
 0x155   : > { %v668_v11 = vmul.f32 0.35355338, %v436_v9  ;;  %v1302_v12 = vpop.f32.mrb[1].mxu0  ;;  %v669_v13 = vmul.f32 0.35355338, %v512_v10  ;;  %v1307_v14 = vpop.f32.mrb[1].mxu1 }
 0x157   : > { %v672_v15 = vsel %vm363_vm1, %v668_v11, -inf  ;;  %v675_v20 = vsel %vm363_vm1, %v669_v13, -inf }
 0x158   : > { %673 = vmax.xlane.f32.xlu0 %v672_v15  ;;  %v588_v16 = vpop.f32.mrb[2].mxu0 }
 0x159   : > { %v670_v17 = vmul.f32 0.35355338, %v588_v16  ;;  %v1312_v18 = vpop.f32.mrb[3].mxu0  ;;  %v664_v19 = vpop.f32.mrb[2].mxu1 }
 0x15a   : > { %v671_v21 = vmul.f32 0.35355338, %v664_v19  ;;  %v1317_v22 = vpop.f32.mrb[3].mxu1 }
 0x15b   : > { %v678_v23 = vsel %vm363_vm1, %v670_v17, -inf }
 0x15c   : > { %676 = vmax.xlane.f32.xlu0 %v675_v20  ;;  %679 = vmax.xlane.f32.xlu1 %v678_v23  ;;  %v681_v24 = vsel %vm363_vm1, %v671_v21, -inf }
 0x160   : > { %682 = vmax.xlane.f32.xlu1 %v681_v24 }
 0x1e5   : > { %v674_v25 = vpop.xlane.xlu0 %673 }
 0x1e6   : > { %v684_v26 = vsub.f32 %v668_v11, %v674_v25 }
 0x1e8   : > { %v688_v27 = vmul.f32 1.442695, %v684_v26 }
 0x1e9   : > { %v677_v28 = vpop.xlane.xlu0 %676  ;;  %v680_v29 = vpop.xlane.xlu1 %679 }
 0x1ea   : > { %1421 = vpow2.f32 %v688_v27  ;;  %v685_v30 = vsub.f32 %v669_v13, %v677_v28  ;;  %v686_v31 = vsub.f32 %v670_v17, %v680_v29 }
 0x1ec   : > { %v690_v32 = vmul.f32 1.442695, %v685_v30  ;;  %v692_v33 = vmul.f32 1.442695, %v686_v31 }
 0x1ed   : > { %v683_v34 = vpop.xlane.xlu1 %682 }
 0x1ee   : > { %1423 = vpow2.f32 %v690_v32  ;;  %v687_v35 = vsub.f32 %v671_v21, %v683_v34 }
 0x1ef   : > { %1425 = vpow2.f32 %v692_v33 }
 0x1f0   : > { %v694_v36 = vmul.f32 1.442695, %v687_v35 }
 0x1f2   : > { %1427 = vpow2.f32 %v694_v36 }
 0x1f4   : > { %v1422_v37 = vpop.eup %1421 }
 0x1f5   : > { %v696_v38 = vsel %vm363_vm1, %v1422_v37, 0.0 }
 0x1f6   : > { %697 = vadd.xlane.f32.xlu0 %v696_v38 }
 0x1f8   : > { %v1424_v39 = vpop.eup %1423 }
 0x1f9   : > { %v1426_v40 = vpop.eup %1425  ;;  %v699_v41 = vsel %vm363_vm1, %v1424_v39, 0.0 }
 0x1fa   : > { %700 = vadd.xlane.f32.xlu1 %v699_v41  ;;  %v702_v42 = vsel %vm363_vm1, %v1426_v40, 0.0 }
 0x1fb   : > { %703 = vadd.xlane.f32.xlu0 %v702_v42 }
 0x1fc   : > { %v1428_v43 = vpop.eup %1427 }
 0x1fd   : > { %v705_v44 = vsel %vm363_vm1, %v1428_v43, 0.0 }
 0x1fe   : > { %706 = vadd.xlane.f32.xlu1 %v705_v44 }
 0x283   : > { %v698_v47 = vpop.xlane.xlu0 %697 }
 0x284   : > { %1429 = vrcp.f32 %v698_v47 }
 0x287   : > { %v701_v48 = vpop.xlane.xlu1 %700 }
 0x288   : > { %v704_v49 = vpop.xlane.xlu0 %703  ;;  %1431 = vrcp.f32 %v701_v48 }
 0x289   : > { %1433 = vrcp.f32 %v704_v49 }
 0x28b   : > { %v707_v50 = vpop.xlane.xlu1 %706 }
 0x28c   : > { %1435 = vrcp.f32 %v707_v50 }
 0x28e   : > { %v1430_v51 = vpop.eup %1429 }
 0x28f   : > { %v716_v52 = vmul.f32 %v1430_v51, %v1422_v37 }
 0x291   : > { %720 = vst.msk [vmem:[%s338_s27] sm:$0xff] %vm363_vm1, %v716_v52  ;;  %1321 = vmatmul.mubr.msk.f32.vlgmr.msra.gmra.mrb[4].mxu0 %vm363_vm1, %v716_v52 }
 0x292   : > { %v1432_v54 = vpop.eup %1431  ;;  %1329 = vmatpush3.msra.mxu0 %v361_v53  ;;  %1330 = vmatprep.mubr.msk.f32.mxu0 %vm1653_vm0, %v1652_v0 }
 0x293   : > { %v1434_v55 = vpop.eup %1433  ;;  %v717_v56 = vmul.f32 %v1432_v54, %v1424_v39 }
 0x294   : > { %v718_v58 = vmul.f32 %v1434_v55, %v1426_v40 }
 0x295   : > { %721 = vst.msk [vmem:[%s338_s27 + $0x8] sm:$0xff] %vm363_vm1, %v717_v56  ;;  %1326 = vmatmul.mubr.msk.f32.vlgmr.msra.gmra.mrb[4].mxu1 %vm363_vm1, %v717_v56 }
 0x296   : > { %v1436_v59 = vpop.eup %1435  ;;  %722 = vst.msk [vmem:[%s338_s27 + $0x10] sm:$0xff] %vm363_vm1, %v718_v58  ;;  %1331 = vmatmul.mubr.msk.f32.vlgmr.msra.gmra.mrb[6].mxu0 %vm363_vm1, %v718_v58  ;;  %1334 = vmatpush3.msra.mxu1 %v362_v57 }
 0x297   : > { %v719_v60 = vmul.f32 %v1436_v59, %v1428_v43  ;;  %1335 = vmatprep.mubr.msk.f32.mxu1 %vm1653_vm0, %v1652_v0 }
 0x299   : > { %723 = vst.msk [vmem:[%s338_s27 + $0x18] sm:$0xff] %vm363_vm1, %v719_v60  ;;  %1336 = vmatmul.mubr.msk.f32.vlgmr.msra.gmra.mrb[6].mxu1 %vm363_vm1, %v719_v60 }
 0x29a   : > { %1540 = shalt.err (!%p1537_p13)
}
 0x29b   : > { %s1541_s6 = scalar_lea.hbm %s1972_s5, 512  ;;  %s1545_s26 = scalar_lea.hbm %s2070_s3, 1024 }
 0x29c   : > { %p1542_p11 = scmp.ne.s32.totalorder %s1972_s5, %s1541_s6  ;;  %p1546_p7 = scmp.lt.u32.totalorder %s1972_s5, %s2070_s3 }
 0x29d   : > { %p1547_p4 = scmp.lt.u32.totalorder %s1545_s26, %s1541_s6  ;;  %p1549_p0 = scmp.lt.u32.totalorder %s1541_s6, %s1972_s5 }
 0x29e   : > { %p1543_p2 = pnand %p1542_p11, %p2103_p10 }
 0x29f   : > { %p1548_p3 = por %p1547_p4, %p1546_p7 }
 0x2a0   : > { %p1544_p5 = pneg %p1543_p2 }
 0x2a1   : > { %p1550_p8 = por %p1549_p0, %p1548_p3 }
 0x2a3   : > { %p1551_p9 = pnand %p1550_p8, %p1544_p5 }
 0x2a5   : > { %1554 = shalt.err (!%p1551_p9)
}
 0x2a6   : > { %s1655_s13 = smov 128   ;;  %s1656_s21 = smov 8  }
 0x2a7   : > { %1344 = dma.vmem_to_hbm [thread:$0]  (%p2103_p10), %s1974_s7, 512, %s1972_s5, %s1021_s11, %s1655_s13, %s1655_s13, %s1656_s21  }
 0x2a8   : > { %s345_s27 = scalar_lea.vmem [#allocation9], %s1896_s14  ;;  %s2014_s5 = scalar_lea.hbm %s2071_s4, %s1280_s19 }
 0x2a9   : > { %s1061_s29 = sshll.u32 %s345_s27, 4  ;;  %s1026_s7 = scalar_lea.sflag [#allocation10], %s1893_s25  ;;  %s2006_s29 = int_to_ptr.vmem [resolvable:$true] %s1061_s29 }
 0x2aa   : > { %s1555_s11 = scalar_lea.vmem %s2006_s29, 512  ;;  %s1657_s12 = smov [#allocation9]  }
 0x2ab   : > { %p1556_p12 = scmp.ne.s32.totalorder %s2006_s29, %s1555_s11  ;;  %s1559_s20 = sshll.u32 %s1657_s12, 4  ;;  %s1560_s20 = int_to_ptr.vmem [resolvable:$false] %s1559_s20 }
 0x2ac   : > { %s1561_s1 = scalar_lea.vmem %s1560_s20, 1024  ;;  %p1562_p13 = scmp.lt.s32.totalorder %s2006_s29, %s1560_s20 }
 0x2ad   : > { %p1557_p1 = pnand %p1556_p12, %p2103_p10  ;;  %p1563_p11 = scmp.lt.s32.totalorder %s1561_s1, %s1555_s11 }
 0x2af   : > { %p1558_p6 = pneg %p1557_p1  ;;  %p1564_p2 = por %p1563_p11, %p1562_p13 }
 0x2b1   : > { %p1565_p5 = pnand %p1564_p2, %p1558_p6 }
 0x364   : > { %v793_v61 = vpop.f32.mrb[4].mxu0 }
 0x365   : > { %1016 = vst.msk [vmem:[%s345_s27] sm:$0xff] %vm363_vm1, %v793_v61  ;;  %v1322_v62 = vpop.f32.mrb[5].mxu0 }
 0x368   : > { %v866_v63 = vpop.f32.mrb[4].mxu1 }
 0x369   : > { %1017 = vst.msk [vmem:[%s345_s27 + $0x8] sm:$0xff] %vm363_vm1, %v866_v63  ;;  %v939_v0 = vpop.f32.mrb[6].mxu0  ;;  %v1327_v1 = vpop.f32.mrb[5].mxu1 }
 0x36a   : > { %1018 = vst.msk [vmem:[%s345_s27 + $0x10] sm:$0xff] %vm363_vm1, %v939_v0  ;;  %v1332_v2 = vpop.f32.mrb[7].mxu0 }
 0x36c   : > { %v1012_v3 = vpop.f32.mrb[6].mxu1 }
 0x36d   : > { %1019 = vst.msk [vmem:[%s345_s27 + $0x18] sm:$0xff] %vm363_vm1, %v1012_v3  ;;  %v1337_v4 = vpop.f32.mrb[7].mxu1 }
 0x36e   : > { %1568 = shalt.err (!%p1565_p5)
}
 0x36f   : > { %s1569_s18 = scalar_lea.hbm %s2014_s5, 512  ;;  %s1573_s6 = scalar_lea.hbm %s2071_s4, 1024 }
 0x370   : > { %p1570_p7 = scmp.ne.s32.totalorder %s2014_s5, %s1569_s18  ;;  %p1574_p0 = scmp.lt.u32.totalorder %s2014_s5, %s2071_s4 }
 0x371   : > { %p1575_p8 = scmp.lt.u32.totalorder %s1573_s6, %s1569_s18  ;;  %p1577_p12 = scmp.lt.u32.totalorder %s1569_s18, %s2014_s5 }
 0x372   : > { %p1571_p4 = pnand %p1570_p7, %p2103_p10 }
 0x373   : > { %p1576_p9 = por %p1575_p8, %p1574_p0 }
 0x374   : > { %p1572_p3 = pneg %p1571_p4 }
 0x375   : > { %p1578_p1 = por %p1577_p12, %p1576_p9 }
 0x377   : > { %p1579_p6 = pnand %p1578_p1, %p1572_p3 }
 0x379   : > { %1582 = shalt.err (!%p1579_p6)
}
 0x37a   : > { %1345 = dma.vmem_to_hbm [thread:$0]  (%p2103_p10), %s2006_s29, 512, %s2014_s5, %s1026_s7, %s1655_s13, %s1655_s13, %s1656_s21  }
 0x37b PF: > { %s2104_s26 = sld [smem:[#allocation16_spill]]  ;;  %s1076_s22 = sand.u32 1, %s1625_s15  }
 0x37c   : > { %p2105_p13 = scmp.ne.s32.totalorder %s2091_s30, 0  ;;  %s1077_s24 = scalar_lea.sflag [#allocation4], %s1076_s22 }
 0x381   : > { %p2106_p11 = scmp.ge.s32.totalorder %s2104_s26, 2 }
 0x383   : > { %p1359_p2 = pnand %p2106_p11, %p2105_p13 }
 0x385   : > { %1616 = dma.done.wait (!%p1359_p2), %s1077_s24, 512  }
 0x386   : > { %1618 = vsyncadd (!%p1359_p2), %s1077_s24, 4294966784  ;;  %s1086_s28 = scalar_lea.sflag [#allocation10], %s1076_s22 }
 0x387   : > { %1620 = dma.done.wait (!%p1359_p2), %s1086_s28, 512  }
 0x388   : > { %1622 = vsyncadd (!%p1359_p2), %s1086_s28, 4294966784  ;;  %s27_s20 = sadd.s32 1, %s2104_s26   ;;  %s2107_s25 = sld [smem:[#allocation18_spill]] }
 0x389   : > { %p24_p5 = scmp.ge.s32.totalorder %s27_s20, 4   ;;  %s2108_s18 = sld [smem:[#allocation15_spill]] }
 0x38a   : > { %s2109_s19 = sld [smem:[#allocation17_spill]]  ;;  %s2110_s15 = smov %s1629_s16 }
 0x38b   : > { %s2111_s16 = smov %s1633_s17  ;;  %26 = sbr.rel (!%p24_p5) target bundleno = 12 (0xc), region = 118 }
 0x38e   : > { %s2112_s17 = smov %s2107_s25 }
 0x392   :  { %1091 = vsyncpa [#allocation3], 1 }
 0x393   :  { %1093 = vsyncpa [#allocation3 + $0x1], 1 }
 0x394   :  { %1094 = vsyncpa [#allocation6], 1 }
 0x395   :  { %1096 = vsyncpa [#allocation6 + $0x1], 1 }
 0x396   :  { %1097 = vsyncpa [#allocation4], 1 }
 0x397   :  { %1099 = vsyncpa [#allocation4 + $0x1], 1 }
 0x398   :  { %1100 = vsyncpa [#allocation10], 1 }
 0x399   :  { %1102 = vsyncpa [#allocation10 + $0x1], 1 }

</bundles_post_ra>
